<compile_context>
chip_gen: v5e
topology: v5e:2x2
jax: 0.10.0
libtpu: 0.0.40
codegen_flags: <defaults>
</compile_context>

<pallas_src>
import jax
import jax.numpy as jnp
from jax.experimental import pallas as pl
from jax.experimental.pallas import tpu as pltpu


def _round_up(x, m):
    return ((x + m - 1) // m) * m


def _cdiv(a, b):
    return (a + b - 1) // b


def _vmem_capacity_bytes():
    """Physical VMEM per TensorCore; conservative 64 MiB (v7x-sized) fallback."""
    try:
        cap = getattr(pltpu.get_tpu_info(), "vmem_capacity_bytes", None)
        if cap:
            return int(cap)
    except Exception:
        pass
    return 64 * 1024 * 1024


def ffn_kernel_f32out(x_ref, w1_ref, b1_ref, w2_ref, b2_ref, o_ref):
    """FFN step for float32 outputs: accumulate directly into the resident
    output block (no separate scratch).

    Grid = (row tiles i [parallel], hidden tiles k [arbitrary/reduction]).
      x_ref : (tm, E)  input rows          (compute dtype)
      w1_ref: (E, th)  column slice of W1  (compute dtype)
      b1_ref: (1, th)  f32
      w2_ref: (th, E)  row slice of W2     (compute dtype)
      b2_ref: (1, E)   f32
      o_ref : (tm, E)  f32 output rows, VMEM-resident across k
    """
    k = pl.program_id(1)

    # First matmul on the MXU with f32 accumulation; bias + ReLU on the f32
    # result (keeps the VPU on its f32 path even with bf16 MXU inputs).
    h = jnp.dot(x_ref[...], w1_ref[...], preferred_element_type=jnp.float32)
    h = jnp.maximum(h + b1_ref[...], 0.0)
    contrib = jnp.dot(h.astype(w2_ref.dtype), w2_ref[...],
                      preferred_element_type=jnp.float32)

    @pl.when(k == 0)
    def _():
        o_ref[...] = contrib + b2_ref[...]   # write (no zero-init pass)

    @pl.when(k > 0)
    def _():
        o_ref[...] += contrib


def ffn_kernel_lowp_out(x_ref, w1_ref, b1_ref, w2_ref, b2_ref, o_ref, acc_ref):
    """FFN step for 16-bit outputs: f32 VMEM accumulator, single final store."""
    k = pl.program_id(1)

    h = jnp.dot(x_ref[...], w1_ref[...], preferred_element_type=jnp.float32)
    h = jnp.maximum(h + b1_ref[...], 0.0)
    contrib = jnp.dot(h.astype(w2_ref.dtype), w2_ref[...],
                      preferred_element_type=jnp.float32)

    @pl.when(k == 0)
    def _():
        acc_ref[...] = contrib + b2_ref[...]

    @pl.when(k > 0)
    def _():
        acc_ref[...] += contrib

    @pl.when(k == pl.num_programs(1) - 1)
    def _():
        o_ref[...] = acc_ref[...].astype(o_ref.dtype)


def feed_forward(x, w1, b1, w2, b2, *, tm=None, th=None, compute_dtype=None,
                 vmem_capacity_bytes=None):
    """FeedForward: Linear(E,4E) -> ReLU -> Linear(4E,E) -> Dropout(eval=id).

    x: (..., E). Returns same shape/dtype as x.
      tm: row tile over the flattened (M, E) rows (auto-planned if None).
      th: hidden-dim reduction tile (auto: th=H if the weights fit in VMEM,
          else a >=128 divisor of H); must divide H.
      compute_dtype: optional MXU input dtype (bf16 recommended on all TPU
          generations, incl. v5e); accumulation, biases and ReLU stay in f32.
          Outputs are slightly different (~1e-2 rel.) from an f32 reference.
      Pre-cast w1/w2 to compute_dtype at parameter-load time to avoid a
      per-call cast pass (the wrapper skips the cast when dtypes match).
    """
    *lead, E = x.shape
    M = 1
    for d in lead:
        M *= d
    H = w1.shape[1]
    assert w2.shape == (H, E), f"w2 must be ({H},{E}), got {w2.shape}"

    out_dtype = jnp.dtype(x.dtype)
    cdt = jnp.dtype(compute_dtype) if compute_dtype is not None else out_dtype
    cb = cdt.itemsize
    ob = out_dtype.itemsize
    f32_out = out_dtype == jnp.dtype(jnp.float32)
    row_align = 16 if cb == 2 else 8

    # Generation-aware VMEM budgets (v5e/v6e: 128 MiB, v7x: 64 MiB).
    vmem_cap = int(vmem_capacity_bytes or _vmem_capacity_bytes())
    budget = int(vmem_cap * 0.68)       # block + scratch footprint budget
    vmem_limit = int(vmem_cap * 0.75)   # ~96 MiB on v5e/v6e, ~48 MiB on v7x

    M_al = max(row_align, _round_up(M, row_align))

    def block_bytes(tm_, th_):
        f = 2 * tm_ * E * cb            # x blocks (double-buffered)
        f += 2 * E * th_ * cb           # W1 blocks
        f += 2 * th_ * E * cb           # W2 blocks
        f += 2 * tm_ * E * ob           # output blocks
        f += tm_ * th_ * 4              # (tm, th) f32 hidden activations
        if not f32_out:
            f += tm_ * E * 4            # f32 accumulator scratch
        f += 2 * (th_ + E) * 4          # bias blocks
        return f

    def max_tm(th_, row_target):
        t = min(_round_up(row_target, row_align), M_al)
        t = max(t, row_align)
        while t > row_align and block_bytes(t, th_) > budget:
            t -= row_align
        return t

    if th is None:
        # Prefer keeping all of W1/W2 resident in VMEM (single HBM fetch for
        # the whole call); otherwise stream the hidden dim in wide slices.
        if block_bytes(min(128, M_al), H) <= budget:
            th = H
        else:
            th = next((t for t in (1024, 512, 256, 128) if t < H and H % t == 0), H)
    assert H % th == 0, f"hidden tile {th} must divide H={H}"

    if tm is None:
        if th == H:
            tm = max_tm(th, 512)
            # Weights resident -> splitting rows is free: keep >=2 row tiles so
            # ("parallel", ...) can shard across v7x's two TensorCores.
            if M_al >= 2 * row_align:
                tm = min(tm, _round_up(_cdiv(M_al, 2), row_align))
        else:
            # Streaming weights: push the row tile toward the MXU roofline knee
            # (v6e needs ~512-768 bf16 rows to beat the weight DMA stream).
            tm = max_tm(th, 768)
    tm = _round_up(max(row_align, min(tm, M_al)), row_align)

    grid = (_cdiv(M, tm), H // th)

    # No host-side padding: the last row tile is a masked partial block.
    x2 = x.reshape(M, E)
    if x2.dtype != cdt:
        x2 = x2.astype(cdt)
    w1c = w1 if w1.dtype == cdt else w1.astype(cdt)   # pre-cast params -> no-op
    w2c = w2 if w2.dtype == cdt else w2.astype(cdt)
    b1_2 = b1.reshape(1, H).astype(jnp.float32)
    b2_2 = b2.reshape(1, E).astype(jnp.float32)

    if f32_out:
        kernel = ffn_kernel_f32out
        scratch_shapes = []
    else:
        kernel = ffn_kernel_lowp_out
        scratch_shapes = [pltpu.VMEM((tm, E), jnp.float32)]

    out2 = pl.pallas_call(
        kernel,
        out_shape=jax.ShapeDtypeStruct((M, E), out_dtype),
        grid_spec=pltpu.PrefetchScalarGridSpec(
            num_scalar_prefetch=0,
            grid=grid,
            in_specs=[
                pl.BlockSpec((tm, E), lambda i, k: (i, 0)),   # x row tile
                # If a profile still shows exposed weight DMA on v5e/v6e, add
                # pipeline_mode=pl.Buffered(3) to the two weight specs below.
                pl.BlockSpec((E, th), lambda i, k: (0, k)),   # W1 slice (const when th==H)
                pl.BlockSpec((1, th), lambda i, k: (0, k)),   # b1 slice
                pl.BlockSpec((th, E), lambda i, k: (k, 0)),   # W2 slice (const when th==H)
                pl.BlockSpec((1, E), lambda i, k: (0, 0)),    # b2
            ],
            out_specs=pl.BlockSpec((tm, E), lambda i, k: (i, 0)),
            scratch_shapes=scratch_shapes,
        ),
        compiler_params=pltpu.CompilerParams(
            # Row tiles shard across TensorCores; hidden axis is a reduction.
            dimension_semantics=("parallel", "arbitrary"),
            vmem_limit_bytes=vmem_limit,
        ),
    )(x2, w1c, b1_2, w2c, b2_2)

    return out2.reshape(*lead, E)


def init_params(key, embedding_size):
    """Deterministic init mimicking nn.Linear default (uniform +/- 1/sqrt(fan_in))."""
    E = embedding_size
    H = 4 * E
    k1, k2, k3, k4 = jax.random.split(key, 4)
    lim1 = 1.0 / jnp.sqrt(E)
    lim2 = 1.0 / jnp.sqrt(H)
    w1 = jax.random.uniform(k1, (E, H), jnp.float32, -lim1, lim1)
    b1 = jax.random.uniform(k2, (H,), jnp.float32, -lim1, lim1)
    w2 = jax.random.uniform(k3, (H, E), jnp.float32, -lim2, lim2)
    b2 = jax.random.uniform(k4, (E,), jnp.float32, -lim2, lim2)
    return w1, b1, w2, b2


if __name__ == "__main__":
    key = jax.random.PRNGKey(0)
    # Small but lane-dense shapes: E=128 (multiple of 128), H=4*E=512.
    # B*T=96 is deliberately NOT a multiple of the explicit row tile below,
    # exercising the masked partial row tile (no host-side padding pass).
    B, T, E = 2, 48, 128

    kx, kp = jax.random.split(key)
    x = jax.random.normal(kx, (B, T, E), dtype=jnp.float32)
    w1, b1, w2, b2 = init_params(kp, E)

    # Plain-JAX reference (eval mode: dropout == identity).
    ref = jnp.maximum(x.reshape(-1, E) @ w1 + b1, 0.0) @ w2 + b2
    ref = ref.reshape(B, T, E)

    # Run 1: f32, explicit small tiles -> partial last row tile, multi-step
    # hidden reduction, direct accumulation into the f32 output block.
    out = feed_forward(x, w1, b1, w2, b2, tm=64, th=128)
    out = jax.block_until_ready(out)
    assert out.shape == (B, T, E)
    assert jnp.allclose(out, ref, atol=1e-4, rtol=1e-4)

    # Run 2: auto-planned tiles -> weights fully VMEM-resident (th=H, single
    # hidden step, one HBM fetch of W1/W2), >=2 row tiles for megacore.
    out_auto = feed_forward(x, w1, b1, w2, b2)
    out_auto = jax.block_until_ready(out_auto)
    assert out_auto.shape == (B, T, E)
    assert jnp.allclose(out_auto, ref, atol=1e-4, rtol=1e-4)

    # Run 3: bf16 everywhere (params pre-cast once at "load time" as
    # recommended; beneficial on v5e as well as v6e/v7x). Uses the 16-bit
    # output path with an f32 VMEM accumulator -> looser tolerance vs f32 ref.
    xb = x.astype(jnp.bfloat16)
    w1b, w2b = w1.astype(jnp.bfloat16), w2.astype(jnp.bfloat16)
    out_bf16 = feed_forward(xb, w1b, b1, w2b, b2, compute_dtype=jnp.bfloat16)
    out_bf16 = jax.block_until_ready(out_bf16)
    assert out_bf16.shape == (B, T, E)
    assert out_bf16.dtype == jnp.bfloat16
    assert jnp.allclose(out_bf16.astype(jnp.float32), ref, atol=0.1, rtol=0.1)

    print("KERNEL_OK")
</pallas_src>

<mosaic_0001>
module attributes {stable_mosaic.version = 11 : i64} {
  func.func @ffn_kernel_f32out(%arg0: i32, %arg1: i32, %arg2: memref<64x128xf32, #tpu.memory_space<vmem>>, %arg3: memref<128x128xf32, #tpu.memory_space<vmem>>, %arg4: memref<1x128xf32, #tpu.memory_space<vmem>>, %arg5: memref<128x128xf32, #tpu.memory_space<vmem>>, %arg6: memref<1x128xf32, #tpu.memory_space<vmem>>, %arg7: memref<64x128xf32, #tpu.memory_space<vmem>>) attributes {dimension_semantics = [#tpu.dimension_semantics<parallel>, #tpu.dimension_semantics<arbitrary>], iteration_bounds = array<i64: 2, 4>, scalar_prefetch = 0 : i64, scratch_operands = 0 : i64, tpu.core_type = #tpu.core_type<tc>, window_params = [{transform_indices = @transform_0, window_bounds = array<i64: 64, 128>}, {transform_indices = @transform_1, window_bounds = array<i64: 128, 128>}, {transform_indices = @transform_2, window_bounds = array<i64: 1, 128>}, {transform_indices = @transform_3, window_bounds = array<i64: 128, 128>}, {pipeline_mode = #tpu.pipeline_mode<synchronous>, transform_indices = @transform_4, window_bounds = array<i64: 1, 128>}, {transform_indices = @transform_5, window_bounds = array<i64: 64, 128>}]} {
    %c0 = arith.constant 0 : index
    %c0_0 = arith.constant 0 : index
    %0 = vector.load %arg2[%c0, %c0_0] : memref<64x128xf32, #tpu.memory_space<vmem>>, vector<64x128xf32>
    %c0_1 = arith.constant 0 : index
    %c0_2 = arith.constant 0 : index
    %1 = vector.load %arg3[%c0_1, %c0_2] : memref<128x128xf32, #tpu.memory_space<vmem>>, vector<128x128xf32>
    %cst = arith.constant dense<0.000000e+00> : vector<64x128xf32>
    %2 = tpu.matmul %0, %1, %cst {dimension_numbers = #tpu.dot_dimension_numbers<[1], [0], [0], [1], [0, 0, 1, 1], [], []>} : vector<64x128xf32>, vector<128x128xf32>, vector<64x128xf32> -> vector<64x128xf32>
    %c0_3 = arith.constant 0 : index
    %c0_4 = arith.constant 0 : index
    %3 = vector.load %arg4[%c0_3, %c0_4] : memref<1x128xf32, #tpu.memory_space<vmem>>, vector<1x128xf32>
    %4 = vector.broadcast %3 : vector<1x128xf32> to vector<64x128xf32>
    %5 = arith.addf %2, %4 : vector<64x128xf32>
    %cst_5 = arith.constant 0.000000e+00 : f32
    %6 = vector.broadcast %cst_5 : f32 to vector<64x128xf32>
    %7 = arith.maximumf %5, %6 : vector<64x128xf32>
    %c0_6 = arith.constant 0 : index
    %c0_7 = arith.constant 0 : index
    %8 = vector.load %arg5[%c0_6, %c0_7] : memref<128x128xf32, #tpu.memory_space<vmem>>, vector<128x128xf32>
    %cst_8 = arith.constant dense<0.000000e+00> : vector<64x128xf32>
    %9 = tpu.matmul %7, %8, %cst_8 {dimension_numbers = #tpu.dot_dimension_numbers<[1], [0], [0], [1], [0, 0, 1, 1], [], []>} : vector<64x128xf32>, vector<128x128xf32>, vector<64x128xf32> -> vector<64x128xf32>
    %c0_i32 = arith.constant 0 : i32
    %10 = arith.cmpi eq, %arg1, %c0_i32 : i32
    %11 = arith.extui %10 : i1 to i32
    %c0_i32_9 = arith.constant 0 : i32
    %12 = arith.cmpi ne, %11, %c0_i32_9 : i32
    scf.if %12 {
      %c0_12 = arith.constant 0 : index
      %c0_13 = arith.constant 0 : index
      %16 = vector.load %arg6[%c0_12, %c0_13] : memref<1x128xf32, #tpu.memory_space<vmem>>, vector<1x128xf32>
      %17 = vector.broadcast %16 : vector<1x128xf32> to vector<64x128xf32>
      %18 = arith.addf %9, %17 : vector<64x128xf32>
      %c0_14 = arith.constant 0 : index
      %c0_15 = arith.constant 0 : index
      %19 = vector.load %arg7[%c0_14, %c0_15] : memref<64x128xf32, #tpu.memory_space<vmem>>, vector<64x128xf32>
      tpu.vector_store %arg7[%c0_14, %c0_15], %18 {strides = array<i32>} : memref<64x128xf32, #tpu.memory_space<vmem>>, vector<64x128xf32>,
    } else {
    }
    %c0_i32_10 = arith.constant 0 : i32
    %13 = arith.cmpi sgt, %arg1, %c0_i32_10 : i32
    %14 = arith.extui %13 : i1 to i32
    %c0_i32_11 = arith.constant 0 : i32
    %15 = arith.cmpi ne, %14, %c0_i32_11 : i32
    scf.if %15 {
      %c0_12 = arith.constant 0 : index
      %c0_13 = arith.constant 0 : index
      %16 = vector.load %arg7[%c0_12, %c0_13] : memref<64x128xf32, #tpu.memory_space<vmem>>, vector<64x128xf32>
      %17 = arith.addf %16, %9 : vector<64x128xf32>
      %c0_14 = arith.constant 0 : index
      %c0_15 = arith.constant 0 : index
      %18 = vector.load %arg7[%c0_14, %c0_15] : memref<64x128xf32, #tpu.memory_space<vmem>>, vector<64x128xf32>
      tpu.vector_store %arg7[%c0_14, %c0_15], %17 {strides = array<i32>} : memref<64x128xf32, #tpu.memory_space<vmem>>, vector<64x128xf32>,
    } else {
    }
    return
  }
  func.func @transform_0(%arg0: i32, %arg1: i32) -> (i32, i32) {
    %c0_i32 = arith.constant 0 : i32
    %c0_i32_0 = arith.constant 0 : i32
    return %arg0, %c0_i32 : i32, i32
  }
  func.func @transform_1(%arg0: i32, %arg1: i32) -> (i32, i32) {
    %c0_i32 = arith.constant 0 : i32
    %c0_i32_0 = arith.constant 0 : i32
    return %c0_i32, %arg1 : i32, i32
  }
  func.func @transform_2(%arg0: i32, %arg1: i32) -> (i32, i32) {
    %c0_i32 = arith.constant 0 : i32
    %c0_i32_0 = arith.constant 0 : i32
    return %c0_i32, %arg1 : i32, i32
  }
  func.func @transform_3(%arg0: i32, %arg1: i32) -> (i32, i32) {
    %c0_i32 = arith.constant 0 : i32
    %c0_i32_0 = arith.constant 0 : i32
    return %arg1, %c0_i32 : i32, i32
  }
  func.func @transform_4(%arg0: i32, %arg1: i32) -> (i32, i32) {
    %c0_i32 = arith.constant 0 : i32
    %c0_i32_0 = arith.constant 0 : i32
    %c0_i32_1 = arith.constant 0 : i32
    return %c0_i32, %c0_i32_0 : i32, i32
  }
  func.func @transform_5(%arg0: i32, %arg1: i32) -> (i32, i32) {
    %c0_i32 = arith.constant 0 : i32
    %c0_i32_0 = arith.constant 0 : i32
    return %arg0, %c0_i32 : i32, i32
  }
}

</mosaic_0001>

<bundles_post_ra>
// kernel: tpu_custom_call.1
= control target key start
LH: loop header
LB: loop body
LE: loop exit
PB: predicated region body
PF: predicated region fallthrough
CT: control target
= control target key end

     0   :  { %s1621_s0 = inlined_call_operand.hbm [shape: f32[96,128], index: 0, kind: input, shape index: {}]   ;;  %s1622_s1 = inlined_call_operand.hbm [shape: f32[128,512], index: 1, kind: input, shape index: {}]   ;;  %s1623_s2 = inlined_call_operand.hbm [shape: f32[1,512], index: 2, kind: input, shape index: {}]   ;;  %s1624_s3 = inlined_call_operand.hbm [shape: f32[512,128], index: 3, kind: input, shape index: {}]   ;;  %s1625_s4 = inlined_call_operand.vmem [shape: f32[1,128], index: 4, kind: input, shape index: {}]   ;;  %s1626_s5 = inlined_call_operand.hbm [shape: f32[96,128], index: 5, kind: output, shape index: {}]  }
   0x1   :  { %1639 = sst [smem:[#allocation26_spill]] %s1621_s0 }
   0x2   :  { %1640 = sst [smem:[#allocation27_spill]] %s1622_s1 }
   0x3   :  { %1641 = sst [smem:[#allocation28_spill]] %s1625_s4 }
   0x4   :  { %1642 = sst [smem:[#allocation29_spill]] %s1626_s5 }
   0x5   :  { %10 = vsyncpa [#allocation3], 0 }
   0x6   :  { %12 = vsyncpa [#allocation3 + $0x1], 0 }
   0x7   :  { %13 = vsyncpa [#allocation6], 0 }
   0x8   :  { %15 = vsyncpa [#allocation6 + $0x1], 0 }
   0x9   :  { %16 = vsyncpa [#allocation9], 0 }
   0xa   :  { %18 = vsyncpa [#allocation9 + $0x1], 0 }
   0xb   :  { %19 = vsyncpa [#allocation4], 0 }
   0xc   :  { %21 = vsyncpa [#allocation4 + $0x1], 0  ;;  %s1227_s18 = smov 0   ;;  %s1229_s19 = smov 0  }
   0xd   :  { %s1231_s20 = smov 0   ;;  %s1233_s21 = smov 0  }
   0xe   :  { %s1235_s22 = smov 0   ;;  %s1237_s23 = smov 0  }
   0xf   :  { %s1239_s24 = smov 0   ;;  %s1241_s25 = smov 0  }
  0x10   :  { %s1243_s26 = smov 0   ;;  %s1245_s27 = smov 0  }
  0x11   :  { %s1247_s28 = smov 0  }
  0x12 LB: > { %1643 = sst [smem:[#allocation15_spill]] %s1154_s20  ;;  %s1283_s29 = sadd.s32 4294967295, %s1186_s28   ;;  %s1186_s28 = sphi %s1247_s28, %s27_s28   ;;  %s1182_s27 = sphi %s1245_s27, %s1678_s27   ;;  %s1178_s26 = sphi %s1243_s26, %s1684_s26   ;;  %s1174_s25 = sphi %s1241_s25, %s1676_s25   ;;  %s1170_s24 = sphi %s1239_s24, %s1683_s24   ;;  %s1166_s23 = sphi %s1237_s23, %s1675_s23   ;;  %s1162_s22 = sphi %s1235_s22, %s1682_s22   ;;  %s1158_s21 = sphi %s1233_s21, %s1681_s21   ;;  %s1154_s20 = sphi %s1231_s20, %s1673_s20   ;;  %s1150_s19 = sphi %s1229_s19, %s1680_s19   ;;  %s1146_s18 = sphi %s1227_s18, %s1679_s18  }
  0x13   : > { %1644 = sst [smem:[#allocation16_spill]] %s1158_s21  ;;  %s746_s30 = sadd.s32 4294967294, %s1186_s28  }
  0x14   : > { %1645 = sst [smem:[#allocation17_spill]] %s1166_s23  ;;  %s36_s6 = sadd.s32 1, %s1178_s26 }
  0x15   : > { %1646 = sst [smem:[#allocation18_spill]] %s1174_s25  ;;  %s39_s7 = sadd.s32 1, %s1182_s27 }
  0x16   : > { %1647 = sst [smem:[#allocation19_spill]] %s1182_s27  ;;  %p37_p0 = scmp.ge.s32.totalorder %s36_s6, 4 }
  0x17   : > { %s46_s8 = sadd.s32 1, %s1166_s23  ;;  %p53_p1 = scmp.ne.s32.totalorder %s1166_s23, %s1162_s22 }
  0x18   : > { %p54_p2 = scmp.eq.s32.totalorder %s1186_s28, 0  ;;  %s1686_s6 = smov (%p37_p0, %s36_s6), 0 }
  0x19   : > { %1648 = sst [smem:[#allocation20_spill]] %s1686_s6  ;;  %s1688_s7 = smov (!%p37_p0, %s39_s7), %s1182_s27 }
  0x1a   : > { %p1300_p3 = por %p54_p2, %p53_p1  ;;  %p1627_p4 = scmp.ne.s32.totalorder %s1162_s22, %s1158_s21 }
  0x1b   : > { %p41_p5 = scmp.ge.s32.totalorder %s1688_s7, 2  ;;  %p60_p6 = scmp.eq.s32.totalorder %s1283_s29, 0 }
  0x1c   : > { %s69_s10 = ssub.s32 %s1178_s26, %s1686_s6  ;;  %s72_s11 = sadd.s32 1, %s1154_s20 }
  0x1d   : > { %s1690_s7 = smov (%p41_p5, %s1688_s7), 0  ;;  %p1317_p7 = por %p60_p6, %p1627_p4 }
  0x1e   : > { %1650 = sst [smem:[#allocation21_spill]] %s1690_s7  ;;  %p70_p8 = scmp.eq.s32.totalorder %s69_s10, 0 }
  0x1f   : > { %s43_s13 = ssub.s32 %s1182_s27, %s1690_s7  ;;  %p79_p9 = scmp.ne.s32.totalorder %s1154_s20, %s1150_s19 }
  0x20   : > { %p44_p10 = scmp.eq.s32.totalorder %s43_s13, 0  ;;  %p85_p11 = scmp.ne.s32.totalorder %s1150_s19, %s1146_s18 }
  0x21   : > { %s1328_s14 = scalar_select %p70_p8, %s1154_s20, %s72_s11  }
  0x22   : > { %s1331_s15 = scalar_select %p44_p10, %s1166_s23, %s46_s8  }
  0x23   : > { %1652 = sst [smem:[#allocation22_spill]] %s1328_s14  ;;  %p1335_p12 = por %p79_p9, %p54_p2 }
  0x24   : > { %1653 = sst [smem:[#allocation23_spill]] %s1331_s15  ;;  %p1341_p13 = por %p85_p11, %p60_p6 }
  0x25   : > { %p182_p0 = scmp.eq.s32.totalorder %s1283_s29, 7  ;;  %p188_p5 = scmp.eq.s32.totalorder %s746_s30, 7 }
  0x26   : > { %p1658_p8 = scmp.ne.s32.totalorder %s1162_s22, %s1158_s21  ;;  %p748_p2 = scmp.ge.s32.totalorder %s1186_s28, 8 }
  0x27   : > { %p1349_p4 = por %p182_p0, %p53_p1 }
  0x28   : > { %p1356_p10 = por %p188_p5, %p1658_p8  ;;  %207 = sbr.rel (%p748_p2) target bundleno = 103 (0x67), region = 20 }
  0x29   : > { %s1656_s10 = scalar_select %p1349_p4, 1, 0 }
  0x2a   : > { %s1659_s18 = scalar_select %p1356_p10, 1, 0 }
  0x2b   : > { %1657 = sst [smem:[#allocation24_spill]] %s1656_s10 }
  0x2c   : > { %1660 = sst [smem:[#allocation25_spill]] %s1659_s18 }
  0x2d   : > { %210 = sbr.rel (!%p1300_p3) target bundleno = 88 (0x58), region = 24  ;;  %s211_s8 = sand.u32 (%p1300_p3), 1, %s1166_s23  }
  0x2e   : > { %s750_s30 = sshll.u32 (%p1300_p3), %s1182_s27, 3  ;;  %s749_s11 = sshll.u32 (%p1300_p3), %s211_s8, 6 }
  0x2f   : > { %s217_s13 = ssub.s32 (%p1300_p3), 12, %s750_s30  ;;  %s1368_s14 = scalar_lea.sflag (%p1300_p3), [#allocation3], %s211_s8 }
  0x30   : > { %p218_p1 = scmp.lt.s32.totalorder (%p1300_p3), %s217_s13, 8  ;;  %s215_s18 = scalar_lea.vmem (%p1300_p3), [#allocation2], %s749_s11 }
  0x32   : > { %s1692_s13 = smov (!%p218_p1, %s217_s13), 8 }
  0x33   : > { %s751_s7 = sshll.u32 %s1692_s13, 3 }
  0x34   : > { %s221_s6 = ssub.s32 64, %s751_s7 }
  0x35   : > { %s222_s15 = sshll.u32 %s221_s6, 4 }
  0x36   : > { %223 = vsyncadd %s1368_s14, %s222_s15  ;;  %p1371_p3 = scmp.ne.s32.totalorder %s751_s7, 0  ;;  %s777_s30 = sshll.u32 %s1182_s27, 6 }
  0x37   : > { %s1662_s0 = sld [smem:[#allocation26_spill]]  ;;  %s1379_s25 = sshll.u32 %s215_s18, 4  ;;  %s231_s25 = int_to_ptr.vmem [resolvable:$true] %s1379_s25 }
  0x38   : > { %s1635_s15 = sshll.u32 %s1692_s13, 7 }
  0x39   : > { %s924_s7 = sshrl.u32 %s1635_s15, 4 }
  0x3d   : > { %s226_s5 = scalar_lea.hbm %s1662_s0, %s777_s30  ;;  %s933_s18 = scalar_lea.hbm %s1662_s0, 96 }
  0x3e   : > { %s228_s6 = sshll.u32 %s226_s5, 4  ;;  %s1382_s6 = int_to_ptr.hbm [resolvable:$true] %s228_s6 }
  0x3f   : > { %s922_s8 = sshra.s32 %s1382_s6, 4  ;;  %s923_s8 = int_to_ptr.hbm [resolvable:$true] %s922_s8 }
  0x40   : > { %s929_s11 = scalar_lea.hbm %s923_s8, %s924_s7 }
  0x41   : > { %p930_p6 = scmp.ne.s32.totalorder %s923_s8, %s929_s11  ;;  %p935_p0 = scmp.lt.s32.totalorder %s933_s18, %s929_s11 }
  0x43   : > { %p931_p9 = pnand %p930_p6, %p1371_p3 }
  0x45   : > { %p932_p11 = pneg %p931_p9 }
  0x47   : > { %p937_p5 = pnand %p935_p0, %p932_p11 }
  0x49   : > { %940 = shalt.err (!%p937_p5)
}
  0x4a   : > { %s941_s5 = sshra.s32 %s231_s25, 4  ;;  %s1188_s8 = smov [#allocation2]   ;;  %s942_s5 = int_to_ptr.vmem [resolvable:$true] %s941_s5 }
  0x4b   : > { %s948_s30 = scalar_lea.vmem %s942_s5, %s924_s7  ;;  %s952_s15 = scalar_lea.vmem %s1188_s8, 128 }
  0x4c   : > { %p949_p8 = scmp.ne.s32.totalorder %s942_s5, %s948_s30  ;;  %p954_p6 = scmp.lt.s32.totalorder %s952_s15, %s948_s30 }
  0x4e   : > { %p950_p2 = pnand %p949_p8, %p1371_p3 }
  0x50   : > { %p951_p1 = pneg %p950_p2 }
  0x52   : > { %p956_p9 = pnand %p954_p6, %p951_p1 }
  0x54   : > { %959 = shalt.err (!%p956_p9)
}
  0x55   : > { %s1189_s21 = smov 128   ;;  %s1190_s11 = smov 8  }
  0x56   : > { %s1663_s23 = sshll.u32 %s1692_s13, 7 }
  0x57   : > { %236 = dma.hbm_to_vmem [thread:$0]  (%p1371_p3), %s1382_s6, %s1663_s23, %s231_s25, %s1368_s14, %s1189_s21, %s1189_s21, %s1190_s11  }
  0x58 PF: > { %s240_s15 = sand.u32 1, %s1186_s28   ;;  %s1407_s7 = sand.u32 1, %s1154_s20  }
  0x59   : > { %s756_s18 = sshll.u32 %s1407_s7, 7  ;;  %s757_s5 = sshll.u32 %s1178_s26, 3 }
  0x5a   : > { %s1664_s1 = sld [smem:[#allocation27_spill]]  ;;  %s244_s0 = scalar_lea.vmem [#allocation5], %s756_s18 }
  0x5b   : > { %s251_s25 = sshll.u32 %s244_s0, 4  ;;  %s241_s13 = scalar_lea.sflag [#allocation6], %s240_s15  ;;  %s252_s25 = int_to_ptr.vmem [resolvable:$true] %s251_s25 }
  0x5c   : > { %s1191_s6 = smov 512   ;;  %s1192_s21 = smov 128  }
  0x5d   : > { %s1193_s11 = smov 8   ;;  %s267_s30 = scalar_lea.hbm %s1623_s2, %s1178_s26 }
  0x5e   : > { %s264_s8 = scalar_lea.vmem [#allocation7], %s1407_s7  ;;  %s778_s0 = sshll.u32 %s1178_s26, 7 }
  0x5f   : > { %s282_s15 = scalar_lea.vmem [#allocation8], %s756_s18  ;;  %s287_s4 = scalar_lea.hbm %s1624_s3, %s778_s0 }
  0x60   : > { %s248_s9 = scalar_lea.hbm %s1664_s1, %s757_s5  ;;  %s269_s5 = sshll.u32 %s267_s30, 4  ;;  %s270_s5 = int_to_ptr.hbm [resolvable:$true] %s269_s5 }
  0x61   : > { %s249_s14 = sshll.u32 %s248_s9, 4  ;;  %s271_s1 = sshll.u32 %s264_s8, 4  ;;  %s250_s14 = int_to_ptr.hbm [resolvable:$true] %s249_s14  ;;  %s272_s1 = int_to_ptr.vmem [resolvable:$true] %s271_s1 }
  0x62   : > { %812 = dma.hbm_to_vmem [thread:$0]  (%p1335_p12), %s250_s14, 2048, %s252_s25, %s241_s13, %s1191_s6, %s1192_s21, %s1193_s11  }
  0x63   : > { %813 = dma.hbm_to_vmem [thread:$0]  (%p1335_p12), %s270_s5, 16, %s272_s1, %s241_s13  }
  0x64   : > { %s290_s9 = sshll.u32 %s282_s15, 4  ;;  %s288_s25 = sshll.u32 %s287_s4, 4  ;;  %s291_s9 = int_to_ptr.vmem [resolvable:$true] %s290_s9  ;;  %s289_s25 = int_to_ptr.hbm [resolvable:$true] %s288_s25 }
  0x65   : > { %s279_s27 = scalar_lea.sflag [#allocation9], %s1407_s7 }
  0x66   : > { %814 = dma.hbm_to_vmem [thread:$0]  (%p1335_p12), %s289_s25, 2048, %s291_s9, %s279_s27, %s1192_s21, %s1192_s21, %s1193_s11  }
  0x67 PF: > { %p761_p3 = scmp.ge.s32.totalorder %s1186_s28, 1  ;;  %p298_p11 = scmp.lt.s32.totalorder %s1186_s28, 9 }
  0x69   : > { %p299_p0 = pnand %p761_p3, %p298_p11 }
  0x6a   : > { %s1433_s1 = sand.u32 (!%p299_p0), 1, %s1162_s22  }
  0x6b   : > { %302 = sbr.rel (%p299_p0) target bundleno = 515 (0x203), region = 40  ;;  %s762_s20 = sshll.u32 (!%p299_p0), %s1433_s1, 6 }
  0x6c   : > { %s305_s4 = scalar_lea.sflag (!%p299_p0), [#allocation3], %s1433_s1  ;;  %s1439_s10 = scalar_lea.vmem (!%p299_p0), [#allocation2], %s762_s20 }
  0x70   : > { %1129 = dma.done.wait (%p1317_p7), %s305_s4, 1024  }
  0x71   : > { %1131 = vsyncadd (%p1317_p7), %s305_s4, 4294966272  ;;  %s314_s16 = sand.u32 1, %s1283_s29   ;;  %s1447_s7 = sand.u32 1, %s1150_s19  }
  0x72   : > { %s763_s18 = sshll.u32 %s1447_s7, 7  ;;  %s315_s14 = scalar_lea.sflag [#allocation6], %s314_s16 }
  0x73   : > { %s1450_s13 = scalar_lea.vmem [#allocation5], %s763_s18 }
  0x74   : > { %1133 = dma.done.wait (%p1341_p13), %s315_s14, 2064  }
  0x75   : > { %1135 = vsyncadd (%p1341_p13), %s315_s14, 4294965232  ;;  %s327_s12 = scalar_lea.vmem [#allocation7], %s1447_s7  ;;  %s334_s6 = scalar_lea.sflag [#allocation9], %s1447_s7 }
  0x76   : > { %s1458_s21 = scalar_lea.vmem [#allocation8], %s763_s18 }
  0x77   : > { %1137 = dma.done.wait (%p1341_p13), %s334_s6, 2048  }
  0x78   : > { %1139 = vsyncadd (%p1341_p13), %s334_s6, 4294965248  ;;  %v413_v0 = vld [vmem:[%s1450_s13 + $0x78] sm:$0xff]  ;;  %v412_v1 = vld [vmem:[%s1450_s13 + $0x70] sm:$0xff]  ;;  %s1508_s29 = scalar_lea.vmem [#allocation10], %s762_s20  ;;  %p766_p7 = scmp.ne.s32.totalorder %s1170_s24, 0 }
  0x79   : > { %780 = vmatpush.msra.mxu2 %v413_v0  ;;  %418 = vmatpush.msra.mxu0 %v413_v0  ;;  %v411_v2 = vld [vmem:[%s1450_s13 + $0x68] sm:$0xff]  ;;  %v410_v3 = vld [vmem:[%s1450_s13 + $0x60] sm:$0xff]  ;;  %v409_v4 = vld [vmem:[%s1450_s13 + $0x58] sm:$0xff]  ;;  %s1665_s23 = sld [smem:[#allocation28_spill]] (!%p766_p7) }
  0x7a   : > { %v408_v5 = vld [vmem:[%s1450_s13 + $0x50] sm:$0xff]  ;;  %v407_v6 = vld [vmem:[%s1450_s13 + $0x48] sm:$0xff]  ;;  %v406_v7 = vld [vmem:[%s1450_s13 + $0x40] sm:$0xff] }
  0x7b   : > { %781 = vmatpush.msra.mxu2 %v412_v1  ;;  %419 = vmatpush.msra.mxu0 %v412_v1  ;;  %v405_v8 = vld [vmem:[%s1450_s13 + $0x38] sm:$0xff]  ;;  %v404_v9 = vld [vmem:[%s1450_s13 + $0x30] sm:$0xff]  ;;  %v403_v10 = vld [vmem:[%s1450_s13 + $0x28] sm:$0xff] }
  0x7c   : > { %v402_v11 = vld [vmem:[%s1450_s13 + $0x20] sm:$0xff]  ;;  %v401_v12 = vld [vmem:[%s1450_s13 + $0x18] sm:$0xff]  ;;  %v400_v13 = vld [vmem:[%s1450_s13 + $0x10] sm:$0xff] }
  0x7d   : > { %782 = vmatpush.msra.mxu2 %v411_v2  ;;  %420 = vmatpush.msra.mxu0 %v411_v2  ;;  %v482_v14 = vld [vmem:[%s1458_s21 + $0x78] sm:$0xff]  ;;  %v481_v15 = vld [vmem:[%s1458_s21 + $0x70] sm:$0xff]  ;;  %v399_v16 = vld [vmem:[%s1450_s13 + $0x8] sm:$0xff] }
  0x7e   : > { %796 = vmatpush.msra.mxu3 %v482_v14  ;;  %483 = vmatpush.msra.mxu1 %v482_v14  ;;  %v480_v17 = vld [vmem:[%s1458_s21 + $0x68] sm:$0xff]  ;;  %v398_v18 = vld [vmem:[%s1450_s13] sm:$0xff]  ;;  %v477_v23 = vld [vmem:[%s1458_s21 + $0x50] sm:$0xff] }
  0x7f   : > { %783 = vmatpush.msra.mxu2 %v410_v3  ;;  %421 = vmatpush.msra.mxu0 %v410_v3  ;;  %v394_v19 = vld [vmem:[%s1439_s10 + $0x20] sm:$0xff]  ;;  %v476_v24 = vld [vmem:[%s1458_s21 + $0x48] sm:$0xff]  ;;  %v473_v29 = vld [vmem:[%s1458_s21 + $0x30] sm:$0xff] }
  0x80   : > { %797 = vmatpush.msra.mxu3 %v481_v15  ;;  %484 = vmatpush.msra.mxu1 %v481_v15  ;;  %v390_v20 = vld [vmem:[%s1439_s10] sm:$0xff]  ;;  %v395_v25 = vld [vmem:[%s1439_s10 + $0x28] sm:$0xff]  ;;  %v396_v31 = vld [vmem:[%s1439_s10 + $0x30] sm:$0xff] }
  0x81   : > { %784 = vmatpush.msra.mxu2 %v409_v4  ;;  %422 = vmatpush.msra.mxu0 %v409_v4  ;;  %v479_v21 = vld [vmem:[%s1458_s21 + $0x60] sm:$0xff]  ;;  %v478_v22 = vld [vmem:[%s1458_s21 + $0x58] sm:$0xff]  ;;  %v472_v30 = vld [vmem:[%s1458_s21 + $0x28] sm:$0xff] }
  0x82   : > { %798 = vmatpush.msra.mxu3 %v480_v17  ;;  %485 = vmatpush.msra.mxu1 %v480_v17  ;;  %v391_v26 = vld [vmem:[%s1439_s10 + $0x8] sm:$0xff]  ;;  %v474_v28 = vld [vmem:[%s1458_s21 + $0x38] sm:$0xff]  ;;  %v392_v32 = vld [vmem:[%s1439_s10 + $0x10] sm:$0xff] }
  0x83   : > { %785 = vmatpush.msra.mxu2 %v408_v5  ;;  %423 = vmatpush.msra.mxu0 %v408_v5  ;;  %v475_v27 = vld [vmem:[%s1458_s21 + $0x40] sm:$0xff]  ;;  %v470_v34 = vld [vmem:[%s1458_s21 + $0x18] sm:$0xff]  ;;  %v469_v37 = vld [vmem:[%s1458_s21 + $0x10] sm:$0xff] }
  0x84   : > { %799 = vmatpush.msra.mxu3 %v479_v21  ;;  %486 = vmatpush.msra.mxu1 %v479_v21  ;;  %v471_v33 = vld [vmem:[%s1458_s21 + $0x20] sm:$0xff]  ;;  %v397_v35 = vld [vmem:[%s1439_s10 + $0x38] sm:$0xff]  ;;  %v468_v38 = vld [vmem:[%s1458_s21 + $0x8] sm:$0xff] }
  0x85   : > { %786 = vmatpush.msra.mxu2 %v407_v6  ;;  %424 = vmatpush.msra.mxu0 %v407_v6  ;;  %v393_v36 = vld [vmem:[%s1439_s10 + $0x18] sm:$0xff]  ;;  %v467_v39 = vld [vmem:[%s1458_s21] sm:$0xff]  ;;  %v920_v40 = vld [vmem:[%s327_s12] ss:$0 sm:$0xff] }
  0x86   : > { %800 = vmatpush.msra.mxu3 %v478_v22  ;;  %487 = vmatpush.msra.mxu1 %v478_v22 }
  0x87   : > { %787 = vmatpush.msra.mxu2 %v406_v7  ;;  %425 = vmatpush.msra.mxu0 %v406_v7 }
  0x88   : > { %801 = vmatpush.msra.mxu3 %v477_v23  ;;  %488 = vmatpush.msra.mxu1 %v477_v23 }
  0x89   : > { %788 = vmatpush.msra.mxu2 %v405_v8  ;;  %426 = vmatpush.msra.mxu0 %v405_v8 }
  0x8a   : > { %802 = vmatpush.msra.mxu3 %v476_v24  ;;  %489 = vmatpush.msra.mxu1 %v476_v24 }
  0x8b   : > { %789 = vmatpush.msra.mxu2 %v404_v9  ;;  %427 = vmatpush.msra.mxu0 %v404_v9 }
  0x8c   : > { %803 = vmatpush.msra.mxu3 %v475_v27  ;;  %490 = vmatpush.msra.mxu1 %v475_v27 }
  0x8d   : > { %790 = vmatpush.msra.mxu2 %v403_v10  ;;  %428 = vmatpush.msra.mxu0 %v403_v10 }
  0x8e   : > { %804 = vmatpush.msra.mxu3 %v474_v28  ;;  %491 = vmatpush.msra.mxu1 %v474_v28 }
  0x8f   : > { %791 = vmatpush.msra.mxu2 %v402_v11  ;;  %429 = vmatpush.msra.mxu0 %v402_v11 }
  0x90   : > { %805 = vmatpush.msra.mxu3 %v473_v29  ;;  %492 = vmatpush.msra.mxu1 %v473_v29 }
  0x91   : > { %792 = vmatpush.msra.mxu2 %v401_v12  ;;  %430 = vmatpush.msra.mxu0 %v401_v12 }
  0x92   : > { %806 = vmatpush.msra.mxu3 %v472_v30  ;;  %493 = vmatpush.msra.mxu1 %v472_v30 }
  0x93   : > { %793 = vmatpush.msra.mxu2 %v400_v13  ;;  %431 = vmatpush.msra.mxu0 %v400_v13 }
  0x94   : > { %807 = vmatpush.msra.mxu3 %v471_v33  ;;  %494 = vmatpush.msra.mxu1 %v471_v33 }
  0x95   : > { %794 = vmatpush.msra.mxu2 %v399_v16  ;;  %432 = vmatpush.msra.mxu0 %v399_v16 }
  0x96   : > { %808 = vmatpush.msra.mxu3 %v470_v34  ;;  %495 = vmatpush.msra.mxu1 %v470_v34 }
  0x97   : > { %795 = vmatpush.msra.mxu2 %v398_v18  ;;  %433 = vmatpush.msra.mxu0 %v398_v18 }
  0x98   : > { %446 = vmatmul.f32.vlgmr.msra.gmra.mxu2 %v394_v19  ;;  %434 = vmatmul.f32.vlgmr.msra.gmra.mxu0 %v390_v20 }
  0x99   : > { %809 = vmatpush.msra.mxu3 %v469_v37  ;;  %496 = vmatpush.msra.mxu1 %v469_v37 }
  0x9b   : > { %810 = vmatpush.msra.mxu3 %v468_v38  ;;  %497 = vmatpush.msra.mxu1 %v468_v38 }
  0x9d   : > { %811 = vmatpush.msra.mxu3 %v467_v39  ;;  %498 = vmatpush.msra.mxu1 %v467_v39 }
  0xa0   : > { %449 = vmatmul.f32.gmra.mxu2 %v395_v25  ;;  %437 = vmatmul.f32.gmra.mxu0 %v391_v26 }
  0xa8   : > { %452 = vmatmul.f32.gmra.mxu2 %v396_v31  ;;  %440 = vmatmul.f32.gmra.mxu0 %v392_v32 }
  0xb0   : > { %455 = vmatmul.f32.gmra.mxu2 %v397_v35  ;;  %443 = vmatmul.f32.gmra.mxu0 %v393_v36 }
 0x115   : > { %v435_v41 = vpop.f32.mrf.mxu0 }
 0x116   : > { %v436_v42 = vadd.f32 %v920_v40, %v435_v41 }
 0x118   : > { %v459_v43 = vmax.f32 %v436_v42, 0.0 }
 0x11a   : > { %499 = vmatmul.f32.vlgmr.msra.gmra.mxu1 %v459_v43 }
 0x11b   : > { %v447_v44 = vpop.f32.mrf.mxu2 }
 0x11c   : > { %v448_v45 = vadd.f32 %v920_v40, %v447_v44 }
 0x11d   : > { %v438_v46 = vpop.f32.mrf.mxu0 }
 0x11e   : > { %v463_v47 = vmax.f32 %v448_v45, 0.0  ;;  %v439_v48 = vadd.f32 %v920_v40, %v438_v46 }
 0x120   : > { %511 = vmatmul.f32.vlgmr.msra.gmra.mxu3 %v463_v47  ;;  %v460_v49 = vmax.f32 %v439_v48, 0.0 }
 0x122   : > { %502 = vmatmul.f32.gmra.mxu1 %v460_v49 }
 0x123   : > { %v450_v50 = vpop.f32.mrf.mxu2 }
 0x124   : > { %v451_v51 = vadd.f32 %v920_v40, %v450_v50 }
 0x125   : > { %v441_v52 = vpop.f32.mrf.mxu0 }
 0x126   : > { %v464_v53 = vmax.f32 %v451_v51, 0.0  ;;  %v442_v54 = vadd.f32 %v920_v40, %v441_v52 }
 0x128   : > { %514 = vmatmul.f32.gmra.mxu3 %v464_v53  ;;  %v461_v55 = vmax.f32 %v442_v54, 0.0 }
 0x12a   : > { %505 = vmatmul.f32.gmra.mxu1 %v461_v55 }
 0x12b   : > { %v453_v56 = vpop.f32.mrf.mxu2 }
 0x12c   : > { %v454_v57 = vadd.f32 %v920_v40, %v453_v56 }
 0x12d   : > { %v444_v58 = vpop.f32.mrf.mxu0 }
 0x12e   : > { %v465_v59 = vmax.f32 %v454_v57, 0.0  ;;  %v445_v60 = vadd.f32 %v920_v40, %v444_v58 }
 0x130   : > { %517 = vmatmul.f32.gmra.mxu3 %v465_v59  ;;  %v462_v61 = vmax.f32 %v445_v60, 0.0 }
 0x132   : > { %508 = vmatmul.f32.gmra.mxu1 %v462_v61 }
 0x133   : > { %v456_v62 = vpop.f32.mrf.mxu2 }
 0x134   : > { %v457_v63 = vadd.f32 %v920_v40, %v456_v62 }
 0x136   : > { %v466_v0 = vmax.f32 %v457_v63, 0.0 }
 0x138   : > { %520 = vmatmul.f32.gmra.mxu3 %v466_v0 }
 0x197   : > { %v500_v1 = vpop.f32.mrf.mxu1 }
 0x19f   : > { %v503_v2 = vpop.f32.mrf.mxu1 }
 0x1a3   : > { %v512_v3 = vpop.f32.mrf.mxu3 }
 0x1a7   : > { %v506_v4 = vpop.f32.mrf.mxu1 }
 0x1ab   : > { %v515_v5 = vpop.f32.mrf.mxu3 }
 0x1af   : > { %v509_v6 = vpop.f32.mrf.mxu1 }
 0x1b3   : > { %v518_v7 = vpop.f32.mrf.mxu3 }
 0x1b7   : > { %527 = sbr.rel (%p766_p7) target bundleno = 455 (0x1c7), region = 60 }
 0x1bb   : > { %v521_v8 = vpop.f32.mrf.mxu3 }
 0x1bc   : > { %v921_v9 = vld [vmem:[%s1665_s23] ss:$0 sm:$0xff] }
 0x1bd   : > { %v532_v10 = vadd.f32 %v921_v9, %v500_v1  ;;  %v533_v11 = vadd.f32 %v921_v9, %v503_v2  ;;  %v534_v12 = vadd.f32 %v921_v9, %v506_v4  ;;  %v535_v13 = vadd.f32 %v921_v9, %v509_v6 }
 0x1be   : > { %v536_v14 = vadd.f32 %v921_v9, %v512_v3  ;;  %v537_v15 = vadd.f32 %v921_v9, %v515_v5  ;;  %v538_v16 = vadd.f32 %v921_v9, %v518_v7  ;;  %v539_v17 = vadd.f32 %v921_v9, %v521_v8 }
 0x1bf   : > { %540 = vst [vmem:[%s1508_s29] sm:$0xff] %v532_v10 }
 0x1c0   : > { %541 = vst [vmem:[%s1508_s29 + $0x8] sm:$0xff] %v533_v11 }
 0x1c1   : > { %542 = vst [vmem:[%s1508_s29 + $0x10] sm:$0xff] %v534_v12 }
 0x1c2   : > { %543 = vst [vmem:[%s1508_s29 + $0x18] sm:$0xff] %v535_v13 }
 0x1c3   : > { %544 = vst [vmem:[%s1508_s29 + $0x20] sm:$0xff] %v536_v14 }
 0x1c4   : > { %545 = vst [vmem:[%s1508_s29 + $0x28] sm:$0xff] %v537_v15 }
 0x1c5   : > { %546 = vst [vmem:[%s1508_s29 + $0x30] sm:$0xff] %v538_v16 }
 0x1c6   : > { %547 = vst [vmem:[%s1508_s29 + $0x38] sm:$0xff] %v539_v17 }
 0x1c7 PF: > { %p767_p12 = scmp.le.s32.totalorder %s1170_s24, 0 }
 0x1c9   : > { %551 = sbr.rel (%p767_p12) target bundleno = 473 (0x1d9), region = 64 }
 0x1ce   : > { %v552_v18 = vld [vmem:[%s1508_s29] sm:$0xff]  ;;  %v553_v19 = vld [vmem:[%s1508_s29 + $0x8] sm:$0xff]  ;;  %v554_v20 = vld [vmem:[%s1508_s29 + $0x10] sm:$0xff] }
 0x1cf   : > { %v560_v21 = vadd.f32 %v552_v18, %v500_v1  ;;  %v561_v22 = vadd.f32 %v553_v19, %v503_v2  ;;  %v562_v23 = vadd.f32 %v554_v20, %v506_v4  ;;  %v555_v24 = vld [vmem:[%s1508_s29 + $0x18] sm:$0xff]  ;;  %v556_v25 = vld [vmem:[%s1508_s29 + $0x20] sm:$0xff]  ;;  %v557_v26 = vld [vmem:[%s1508_s29 + $0x28] sm:$0xff] }
 0x1d0   : > { %v563_v27 = vadd.f32 %v555_v24, %v509_v6  ;;  %v558_v28 = vld [vmem:[%s1508_s29 + $0x30] sm:$0xff]  ;;  %v564_v29 = vadd.f32 %v556_v25, %v512_v3  ;;  %v559_v30 = vld [vmem:[%s1508_s29 + $0x38] sm:$0xff]  ;;  %v565_v31 = vadd.f32 %v557_v26, %v515_v5 }
 0x1d1   : > { %568 = vst [vmem:[%s1508_s29] sm:$0xff] %v560_v21  ;;  %v566_v32 = vadd.f32 %v558_v28, %v518_v7  ;;  %v567_v33 = vadd.f32 %v559_v30, %v521_v8 }
 0x1d2   : > { %569 = vst [vmem:[%s1508_s29 + $0x8] sm:$0xff] %v561_v22 }
 0x1d3   : > { %570 = vst [vmem:[%s1508_s29 + $0x10] sm:$0xff] %v562_v23 }
 0x1d4   : > { %571 = vst [vmem:[%s1508_s29 + $0x18] sm:$0xff] %v563_v27 }
 0x1d5   : > { %572 = vst [vmem:[%s1508_s29 + $0x20] sm:$0xff] %v564_v29 }
 0x1d6   : > { %573 = vst [vmem:[%s1508_s29 + $0x28] sm:$0xff] %v565_v31 }
 0x1d7   : > { %574 = vst [vmem:[%s1508_s29 + $0x30] sm:$0xff] %v566_v32 }
 0x1d8   : > { %575 = vst [vmem:[%s1508_s29 + $0x38] sm:$0xff] %v567_v33 }
 0x1d9 PF: > { %s577_s24 = scalar_lea.sflag [#allocation4], %s1433_s1  ;;  %583 = sbr.rel (!%p1349_p4) target bundleno = 515 (0x203), region = 68 }
 0x1da   : > { %s1667_s5 = sld [smem:[#allocation18_spill]] (%p1349_p4) }
 0x1e0   : > { %s769_s8 = sshll.u32 %s1667_s5, 3 }
 0x1e1   : > { %s585_s0 = ssub.s32 12, %s769_s8 }
 0x1e2   : > { %p586_p13 = scmp.lt.s32.totalorder %s585_s0, 8 }
 0x1e4   : > { %s1694_s0 = smov (!%p586_p13, %s585_s0), 8 }
 0x1e5   : > { %s770_s15 = sshll.u32 %s1694_s0, 3 }
 0x1e6   : > { %s589_s9 = ssub.s32 64, %s770_s15 }
 0x1e7   : > { %s590_s25 = sshll.u32 %s589_s9, 4 }
 0x1e8   : > { %591 = vsyncadd %s577_s24, %s590_s25  ;;  %p1548_p5 = scmp.ne.s32.totalorder %s770_s15, 0  ;;  %s779_s20 = sshll.u32 %s1667_s5, 6 }
 0x1e9   : > { %s1669_s16 = sld [smem:[#allocation29_spill]]  ;;  %s596_s18 = sshll.u32 %s1508_s29, 4  ;;  %s1557_s18 = int_to_ptr.vmem [resolvable:$true] %s596_s18 }
 0x1ea   : > { %s774_s13 = sshll.u32 %s1694_s0, 7  ;;  %s1045_s12 = sshra.s32 %s1557_s18, 4  ;;  %s1046_s12 = int_to_ptr.vmem [resolvable:$true] %s1045_s12 }
 0x1eb   : > { %s1047_s6 = sshrl.u32 %s774_s13, 4  ;;  %s1194_s17 = smov [#allocation10]  }
 0x1ec   : > { %s1052_s21 = scalar_lea.vmem %s1046_s12, %s1047_s6  ;;  %s1056_s11 = scalar_lea.vmem %s1194_s17, 128 }
 0x1ed   : > { %p1053_p4 = scmp.ne.s32.totalorder %s1046_s12, %s1052_s21  ;;  %p1058_p1 = scmp.lt.s32.totalorder %s1056_s11, %s1052_s21 }
 0x1ef   : > { %s594_s7 = scalar_lea.hbm %s1669_s16, %s779_s20  ;;  %p1054_p8 = pnand %p1053_p4, %p1548_p5 }
 0x1f0   : > { %s598_s14 = sshll.u32 %s594_s7, 4  ;;  %s1559_s14 = int_to_ptr.hbm [resolvable:$true] %s598_s14 }
 0x1f1   : > { %p1055_p2 = pneg %p1054_p8 }
 0x1f3   : > { %p1060_p6 = pnand %p1058_p1, %p1055_p2 }
 0x1f5   : > { %1063 = shalt.err (!%p1060_p6)
}
 0x1f6   : > { %s1064_s29 = sshra.s32 %s1559_s14, 4  ;;  %s1075_s8 = scalar_lea.hbm %s1669_s16, 96  ;;  %s1065_s29 = int_to_ptr.hbm [resolvable:$true] %s1064_s29 }
 0x1f7   : > { %s1071_s23 = scalar_lea.hbm %s1065_s29, %s1047_s6  ;;  %p1076_p0 = scmp.lt.s32.totalorder %s1065_s29, %s1669_s16 }
 0x1f8   : > { %p1072_p9 = scmp.ne.s32.totalorder %s1065_s29, %s1071_s23  ;;  %p1077_p7 = scmp.lt.s32.totalorder %s1075_s8, %s1071_s23 }
 0x1fa   : > { %p1073_p3 = pnand %p1072_p9, %p1548_p5  ;;  %p1078_p12 = por %p1077_p7, %p1076_p0 }
 0x1fc   : > { %p1074_p11 = pneg %p1073_p3 }
 0x1fe   : > { %p1079_p13 = pnand %p1078_p12, %p1074_p11 }
 0x200   : > { %1082 = shalt.err (!%p1079_p13)
}
 0x201   : > { %s1195_s25 = smov 128   ;;  %s1196_s20 = smov 8  }
 0x202   : > { %604 = dma.vmem_to_hbm [thread:$0]  (%p1548_p5), %s1557_s18, %s774_s13, %s1559_s14, %s577_s24, %s1195_s25, %s1195_s25, %s1196_s20  }
 0x203 PF: > { %s1670_s4 = sld [smem:[#allocation16_spill]]  ;;  %p824_p4 = scmp.ge.s32.totalorder %s1186_s28, 2 }
 0x205   : > { %p821_p8 = pnand %p824_p4, %p1356_p10 }
 0x207   : > { %p822_p2 = pneg %p821_p8 }
 0x209   : > { %s613_s7 = sand.u32 1, %s1670_s4  }
 0x20a   : > { %s614_s12 = scalar_lea.sflag [#allocation4], %s613_s7 }
 0x20b   : > { %1141 = dma.done.wait (%p822_p2), %s614_s12, 1024  }
 0x20c   : > { %1143 = vsyncadd (%p822_p2), %s614_s12, 4294966272  ;;  %s27_s28 = sadd.s32 1, %s1186_s28   ;;  %s1672_s1 = sld [smem:[#allocation15_spill]] }
 0x20d   : > { %p24_p1 = scmp.ge.s32.totalorder %s27_s28, 10   ;;  %s1673_s20 = sld [smem:[#allocation22_spill]] }
 0x20e   : > { %s1674_s24 = sld [smem:[#allocation17_spill]]  ;;  %s1679_s18 = smov %s1150_s19 }
 0x20f   : > { %s1675_s23 = sld [smem:[#allocation23_spill]]  ;;  %s1681_s21 = smov %s1162_s22 }
 0x210   : > { %s1676_s25 = sld [smem:[#allocation19_spill]] }
 0x211   : > { %s1677_s0 = sld [smem:[#allocation20_spill]] }
 0x212   : > { %s1678_s27 = sld [smem:[#allocation21_spill]]  ;;  %s1680_s19 = smov %s1672_s1 }
 0x213   :  { %26 = sbr.rel (!%p24_p1) target bundleno = 18 (0x12), region = 130 }
 0x214   : > { %s1682_s22 = smov %s1674_s24  ;;  %s1683_s24 = smov %s1178_s26 }
 0x217   : > { %s1684_s26 = smov %s1677_s0 }
 0x218   :  { %620 = vsyncpa [#allocation3], 1 }
 0x219   :  { %622 = vsyncpa [#allocation3 + $0x1], 1 }
 0x21a   :  { %623 = vsyncpa [#allocation6], 1 }
 0x21b   :  { %625 = vsyncpa [#allocation6 + $0x1], 1 }
 0x21c   :  { %626 = vsyncpa [#allocation9], 1 }
 0x21d   :  { %628 = vsyncpa [#allocation9 + $0x1], 1 }
 0x21e   :  { %629 = vsyncpa [#allocation4], 1 }
 0x21f   :  { %631 = vsyncpa [#allocation4 + $0x1], 1 }

</bundles_post_ra>
